<compile_context>
chip_gen: v5e
topology: v5e:2x2
jax: 0.10.0
libtpu: 0.0.40
codegen_flags: <defaults>
</compile_context>

<pallas_src>
import functools
import math

import jax
import jax.numpy as jnp
from jax.experimental import pallas as pl
from jax.experimental.pallas import tpu as pltpu


_VMEM_LIMIT = 64 * 1024 * 1024  # raise scoped VMEM limit (v5e default is 16 MiB)


def _round_up(x, m):
    return (x + m - 1) // m * m


def _pick_tile(m, cap=512):
    """Largest row tile (multiple of 8, <= cap) dividing the (padded) row count."""
    mp = _round_up(max(m, 8), 8)
    t = max(8, (min(cap, mp) // 8) * 8)
    while mp % t != 0:
        t -= 8
    return t, mp


def _cparams(grid_rank=1):
    return pltpu.CompilerParams(
        dimension_semantics=("parallel",) * grid_rank,
        vmem_limit_bytes=_VMEM_LIMIT)


# ----------------------------------------------------------------------------
# Pallas kernels
# ----------------------------------------------------------------------------
def _linear_kernel(x_ref, w_ref, b_ref, o_ref, *, slope):
    y = jnp.dot(x_ref[...], w_ref[...], preferred_element_type=jnp.float32)
    y = y + b_ref[...]
    if slope is not None:
        y = jnp.where(y >= 0, y, slope * y)
    o_ref[...] = y


def _pdist_kernel(p_ref, sqr_ref, sqc_ref, o_ref):
    # d2 = |pi|^2 + |pj|^2 - 2 p.p'  (K=3 matmul on MXU, norm adds on VPU)
    p = p_ref[0]                                                  # (N, 3)
    pp = jax.lax.dot_general(p, p, (((1,), (1,)), ((), ())),
                             preferred_element_type=jnp.float32)  # (N, N)
    o_ref[0] = sqr_ref[0] + sqc_ref[0] - 2.0 * pp


def _attn_kernel(q_ref, k_ref, v_ref, o_ref, *, heads, scale):
    # All heads of one batch element handled per grid step; output written as a
    # lane-dense (N, d_model) tile.  No scores output (unused downstream).
    # TODO(synk): for large N this should be KV-tiled (flash-style) so the (N,N)
    #             logits never have to fit VMEM on v7x.
    D = q_ref.shape[-1]
    dh = D // heads
    for h in range(heads):
        lo = h * dh
        qh = q_ref[0, :, lo:lo + dh]
        kh = k_ref[0, :, lo:lo + dh]
        vh = v_ref[0, :, lo:lo + dh]
        s = jax.lax.dot_general(qh, kh, (((1,), (1,)), ((), ())),
                                preferred_element_type=jnp.float32) * scale
        m = jnp.max(s, axis=-1, keepdims=True)
        e = jnp.exp(s - m)
        p = e * pl.reciprocal(jnp.sum(e, axis=-1, keepdims=True), approx=True)
        o_ref[0, :, lo:lo + dh] = jnp.dot(p, vh,
                                          preferred_element_type=jnp.float32)


def _conv3d_kernel(xp_ref, w_ref, b_ref, o_ref, *, X, Y, Z, slope):
    # Halo conv: padded slab is resident in VMEM, 27 shifted matmuls accumulate.
    cin = w_ref.shape[1]
    cout = w_ref.shape[2]
    acc = jnp.zeros((X * Y * Z, cout), jnp.float32)
    t = 0
    for dx in range(3):
        for dy in range(3):
            for dz in range(3):
                patch = xp_ref[0, dx:dx + X, dy:dy + Y, dz:dz + Z, :]
                acc = acc + jnp.dot(patch.reshape(X * Y * Z, cin), w_ref[t],
                                    preferred_element_type=jnp.float32)
                t += 1
    y = acc + b_ref[...]
    o_ref[0] = jnp.where(y >= 0, y, slope * y)


def _lfa_pool_kernel_single(lf_ref, watt_ref, wpost_ref, bpost_ref, att_ref,
                            *, k, slope):
    watt = watt_ref[...]
    lf = [lf_ref[:, j, :] for j in range(k)]
    att = [jnp.dot(lf[j], watt, preferred_element_type=jnp.float32)
           for j in range(k)]
    m = att[0]
    for j in range(1, k):
        m = jnp.maximum(m, att[j])
    e = [jnp.exp(a - m) for a in att]
    denom = e[0]
    for j in range(1, k):
        denom = denom + e[j]
    inv = pl.reciprocal(denom, approx=True)
    pooled = e[0] * lf[0]
    for j in range(1, k):
        pooled = pooled + e[j] * lf[j]
    pooled = pooled * inv
    y = jnp.dot(pooled, wpost_ref[...],
                preferred_element_type=jnp.float32) + bpost_ref[...]
    att_ref[...] = jnp.where(y >= 0, y, slope * y)


def _lfa_pool_kernel_both(lf_ref, watt_ref, wpost_ref, bpost_ref,
                          wraw_ref, braw_ref, att_ref, raw_ref, *, k, slope):
    watt = watt_ref[...]
    lf = [lf_ref[:, j, :] for j in range(k)]
    att = [jnp.dot(lf[j], watt, preferred_element_type=jnp.float32)
           for j in range(k)]
    m = att[0]
    for j in range(1, k):
        m = jnp.maximum(m, att[j])
    e = [jnp.exp(a - m) for a in att]
    denom = e[0]
    for j in range(1, k):
        denom = denom + e[j]
    inv = pl.reciprocal(denom, approx=True)
    pooled = e[0] * lf[0]
    raw_sum = lf[0]
    for j in range(1, k):
        pooled = pooled + e[j] * lf[j]
        raw_sum = raw_sum + lf[j]
    pooled = pooled * inv
    y = jnp.dot(pooled, wpost_ref[...],
                preferred_element_type=jnp.float32) + bpost_ref[...]
    att_ref[...] = jnp.where(y >= 0, y, slope * y)
    yr = jnp.dot(raw_sum, wraw_ref[...],
                 preferred_element_type=jnp.float32) + braw_ref[...]
    raw_ref[...] = jnp.where(yr >= 0, yr, slope * yr)


def _gate_fuse_kernel(s0_ref, s1_ref, s2_ref, wg0, bg0, wg1, bg1, wg2, bg2,
                      wf, bf, o_ref, *, slope):
    def gate(s, w, b):
        g = jnp.dot(s, w[...], preferred_element_type=jnp.float32) + b[...]
        g = jnp.where(g >= 0, g, slope * g)
        return jax.nn.sigmoid(g)

    s0 = s0_ref[...]
    s1 = s1_ref[...]
    s2 = s2_ref[...]
    g = gate(s0, wg0, bg0) + gate(s1, wg1, bg1) + gate(s2, wg2, bg2)  # (TM, 3)
    m = jnp.max(g, axis=-1, keepdims=True)
    e = jnp.exp(g - m)
    gs = e * pl.reciprocal(jnp.sum(e, axis=-1, keepdims=True), approx=True)
    fuse = gs[:, 0:1] * s0 + gs[:, 1:2] * s1 + gs[:, 2:3] * s2
    y = jnp.dot(fuse, wf[...], preferred_element_type=jnp.float32) + bf[...]
    o_ref[...] = jnp.where(y >= 0, y, slope * y)


# ----------------------------------------------------------------------------
# Pallas wrappers
# ----------------------------------------------------------------------------
def fused_linear(x, w, b, slope):
    """y = act(x @ w + b) with optional LeakyReLU(slope).  x: (M, K) f32."""
    M, K = x.shape
    N = w.shape[1]
    TM, Mp = _pick_tile(M, 512)
    xp = x if Mp == M else jnp.pad(x, ((0, Mp - M), (0, 0)))
    out = pl.pallas_call(
        functools.partial(_linear_kernel, slope=slope),
        out_shape=jax.ShapeDtypeStruct((Mp, N), jnp.float32),
        grid=(Mp // TM,),
        in_specs=[
            pl.BlockSpec((TM, K), lambda i: (i, 0)),
            pl.BlockSpec((K, N), lambda i: (0, 0)),
            pl.BlockSpec((1, N), lambda i: (0, 0)),
        ],
        out_specs=pl.BlockSpec((TM, N), lambda i: (i, 0)),
        compiler_params=_cparams(1),
    )(xp, w, b.reshape(1, N))
    return out if Mp == M else out[:M]


def pairwise_sqdist(pos):
    """pos: (B, N, 3) -> (B, N, N) squared distances."""
    B, N, _ = pos.shape
    sq = jnp.sum(pos * pos, axis=-1, keepdims=True)        # (B, N, 1)
    sqt = sq.reshape(B, 1, N)                              # (B, 1, N)
    return pl.pallas_call(
        _pdist_kernel,
        out_shape=jax.ShapeDtypeStruct((B, N, N), jnp.float32),
        grid=(B,),
        in_specs=[
            pl.BlockSpec((1, N, 3), lambda b: (b, 0, 0)),
            pl.BlockSpec((1, N, 1), lambda b: (b, 0, 0)),
            pl.BlockSpec((1, 1, N), lambda b: (b, 0, 0)),
        ],
        out_specs=pl.BlockSpec((1, N, N), lambda b: (b, 0, 0)),
        compiler_params=_cparams(1),
    )(pos, sq, sqt)


def mha_attention(q, k, v, heads, scale):
    """q, k, v: (B, N, d_model) -> (B, N, d_model), heads packed per grid step."""
    B, N, D = q.shape
    return pl.pallas_call(
        functools.partial(_attn_kernel, heads=heads, scale=scale),
        out_shape=jax.ShapeDtypeStruct((B, N, D), jnp.float32),
        grid=(B,),
        in_specs=[pl.BlockSpec((1, N, D), lambda b: (b, 0, 0)) for _ in range(3)],
        out_specs=pl.BlockSpec((1, N, D), lambda b: (b, 0, 0)),
        compiler_params=_cparams(1),
    )(q, k, v)


def conv3d_bn_lrelu(x, params, slope=0.1):
    """3x3x3 conv (pad=1) + folded BN + LeakyReLU via an in-VMEM halo kernel."""
    B, X, Y, Z, cin = x.shape
    cout = params['w'].shape[-1]
    xp = jnp.pad(x, ((0, 0), (1, 1), (1, 1), (1, 1), (0, 0)))
    out = pl.pallas_call(
        functools.partial(_conv3d_kernel, X=X, Y=Y, Z=Z, slope=slope),
        out_shape=jax.ShapeDtypeStruct((B, X * Y * Z, cout), jnp.float32),
        grid=(B,),
        in_specs=[
            pl.BlockSpec((1, X + 2, Y + 2, Z + 2, cin),
                         lambda b: (b, 0, 0, 0, 0)),
            pl.BlockSpec((27, cin, cout), lambda b: (0, 0, 0)),
            pl.BlockSpec((1, cout), lambda b: (0, 0)),
        ],
        out_specs=pl.BlockSpec((1, X * Y * Z, cout), lambda b: (b, 0, 0)),
        compiler_params=_cparams(1),
    )(xp, params['w'], params['b'].reshape(1, cout))
    return out.reshape(B, X, Y, Z, cout)


def lfa_attention_pool(lf3, params, k, channels, return_mode, slope=0.2):
    """Fused: mlp_attention matmul + softmax over k + weighted sum + post/raw MLPs."""
    M, _, F = lf3.shape
    c = channels
    TM, Mp = _pick_tile(M, 256)
    if Mp != M:
        lf3 = jnp.pad(lf3, ((0, Mp - M), (0, 0), (0, 0)))
    watt = params['mlp_attention']['w']
    wpost = params['mlp_post_attention']['w']
    bpost = params['mlp_post_attention']['b'].reshape(1, -1)
    lf_spec = pl.BlockSpec((TM, k, F), lambda i: (i, 0, 0))
    grid = (Mp // TM,)
    if return_mode == 'both':
        wraw = params['mlp_raw_features']['w']
        braw = params['mlp_raw_features']['b'].reshape(1, -1)
        att, raw = pl.pallas_call(
            functools.partial(_lfa_pool_kernel_both, k=k, slope=slope),
            out_shape=(jax.ShapeDtypeStruct((Mp, c), jnp.float32),
                       jax.ShapeDtypeStruct((Mp, 4 * c), jnp.float32)),
            grid=grid,
            in_specs=[
                lf_spec,
                pl.BlockSpec((F, F), lambda i: (0, 0)),
                pl.BlockSpec((F, c), lambda i: (0, 0)),
                pl.BlockSpec((1, c), lambda i: (0, 0)),
                pl.BlockSpec((F, 4 * c), lambda i: (0, 0)),
                pl.BlockSpec((1, 4 * c), lambda i: (0, 0)),
            ],
            out_specs=(pl.BlockSpec((TM, c), lambda i: (i, 0)),
                       pl.BlockSpec((TM, 4 * c), lambda i: (i, 0))),
            compiler_params=_cparams(1),
        )(lf3, watt, wpost, bpost, wraw, braw)
        if Mp != M:
            att, raw = att[:M], raw[:M]
        return att, raw
    att = pl.pallas_call(
        functools.partial(_lfa_pool_kernel_single, k=k, slope=slope),
        out_shape=jax.ShapeDtypeStruct((Mp, c), jnp.float32),
        grid=grid,
        in_specs=[
            lf_spec,
            pl.BlockSpec((F, F), lambda i: (0, 0)),
            pl.BlockSpec((F, c), lambda i: (0, 0)),
            pl.BlockSpec((1, c), lambda i: (0, 0)),
        ],
        out_specs=pl.BlockSpec((TM, c), lambda i: (i, 0)),
        compiler_params=_cparams(1),
    )(lf3, watt, wpost, bpost)
    return att if Mp == M else att[:M]


def gate_fuse(s0, s1, s2, gates, fuse, slope=0.2):
    """Fused 3-gate MLP + sigmoid + softmax + weighted sum + fuse MLP."""
    M, C = s0.shape
    TM, Mp = _pick_tile(M, 512)
    if Mp != M:
        pad = ((0, Mp - M), (0, 0))
        s0, s1, s2 = jnp.pad(s0, pad), jnp.pad(s1, pad), jnp.pad(s2, pad)
    feat_spec = pl.BlockSpec((TM, C), lambda i: (i, 0))
    wg_spec = pl.BlockSpec((C, 3), lambda i: (0, 0))
    bg_spec = pl.BlockSpec((1, 3), lambda i: (0, 0))
    out = pl.pallas_call(
        functools.partial(_gate_fuse_kernel, slope=slope),
        out_shape=jax.ShapeDtypeStruct((Mp, C), jnp.float32),
        grid=(Mp // TM,),
        in_specs=[feat_spec, feat_spec, feat_spec,
                  wg_spec, bg_spec, wg_spec, bg_spec, wg_spec, bg_spec,
                  pl.BlockSpec((C, C), lambda i: (0, 0)),
                  pl.BlockSpec((1, C), lambda i: (0, 0))],
        out_specs=pl.BlockSpec((TM, C), lambda i: (i, 0)),
        compiler_params=_cparams(1),
    )(s0, s1, s2,
      gates[0]['w'], gates[0]['b'].reshape(1, 3),
      gates[1]['w'], gates[1]['b'].reshape(1, 3),
      gates[2]['w'], gates[2]['b'].reshape(1, 3),
      fuse['w'], fuse['b'].reshape(1, C))
    return out if Mp == M else out[:M]


# ----------------------------------------------------------------------------
# Parameter initialization (deterministic, synthetic).  BatchNorm is folded in
# eval mode (gamma=1, beta=0, running_mean=0, running_var=1).
# ----------------------------------------------------------------------------
def init_linear(key, kin, kout, bias=True):
    k1, k2 = jax.random.split(key)
    w = jax.random.normal(k1, (kin, kout), jnp.float32) / math.sqrt(kin)
    if bias:
        b = jax.random.normal(k2, (kout,), jnp.float32) * 0.01
    else:
        b = jnp.zeros((kout,), jnp.float32)
    return {'w': w, 'b': b}


def fold_bn(p, eps):
    s = 1.0 / math.sqrt(1.0 + eps)
    return {'w': p['w'] * s, 'b': p['b'] * s}


def init_conv3d(key, cin, cout, eps):
    k1, k2 = jax.random.split(key)
    w = jax.random.normal(k1, (27, cin, cout), jnp.float32) / math.sqrt(27 * cin)
    b = jax.random.normal(k2, (cout,), jnp.float32) * 0.01
    s = 1.0 / math.sqrt(1.0 + eps)
    return {'w': w * s, 'b': b * s}


def shared_mlp(x, params, slope=0.2):
    return fused_linear(x, params['w'], params['b'], slope)


# ----------------------------------------------------------------------------
# LocalFeatureAggregation / DilatedResidualBlock_RanLA  (points branch)
# ----------------------------------------------------------------------------
def init_lfa(key, channels, return_mode):
    ks = jax.random.split(key, 5)
    fd = channels * 2
    p = {
        'mlp_encoder': fold_bn(init_linear(ks[0], 10, channels // 2), 1e-6),
        'mlp_dgcnn': fold_bn(init_linear(ks[1], 3 * (channels // 2), channels), 1e-6),
        'mlp_attention': init_linear(ks[2], fd, fd, bias=False),   # no norm/act
        'mlp_post_attention': fold_bn(init_linear(ks[3], fd, channels), 1e-6),
    }
    if return_mode == 'both':
        p['mlp_raw_features'] = fold_bn(init_linear(ks[4], fd, 4 * channels), 1e-6)
    return p


def lfa_forward(params, idx, x, pos, channels, return_mode):
    # idx: (B, n, k) neighbor indices; x: (B, n, d); pos: (B, n, 3)
    B, n, k = idx.shape
    d = x.shape[-1]
    gather = jax.vmap(lambda a, i: a[i])          # (n,d),(n,k) -> (n,k,d)
    x_j = gather(x, idx)
    pos_j = gather(pos, idx)
    x_i = jnp.broadcast_to(x[:, :, None, :], x_j.shape)
    pos_i = jnp.broadcast_to(pos[:, :, None, :], pos_j.shape)

    E = B * n * k
    x_i_f = x_i.reshape(E, d)
    x_j_f = x_j.reshape(E, d)
    pos_i_f = pos_i.reshape(E, 3)
    pos_j_f = pos_j.reshape(E, 3)

    pos_diff = pos_j_f - pos_i_f
    dist = jnp.sqrt(jnp.sum(pos_diff * pos_diff, axis=1, keepdims=True))
    rel = jnp.concatenate([pos_i_f, pos_j_f, pos_diff, dist], axis=1)      # (E,10)

    lse = shared_mlp(rel, params['mlp_encoder'], 0.2)                       # (E, c/2)
    edge_feature = jnp.concatenate([x_i_f, x_j_f, x_j_f - x_i_f], axis=1)   # (E, 3c/2)
    dgcnn = shared_mlp(edge_feature, params['mlp_dgcnn'], 0.2)              # (E, c)
    local_features = jnp.concatenate([dgcnn, x_j_f, lse], axis=1)           # (E, 2c)

    lf3 = local_features.reshape(B * n, k, 2 * channels)
    return lfa_attention_pool(lf3, params, k, channels, return_mode)


def init_points_encoder(key, d_in, d_out):
    ks = jax.random.split(key, 5)
    return {
        'mlp1': fold_bn(init_linear(ks[0], d_in, d_out // 8), 1e-6),
        'shortcut': fold_bn(init_linear(ks[1], d_in, d_out), 1e-6),
        'mlp2': fold_bn(init_linear(ks[2], d_out // 2, d_out), 1e-6),
        'lfa1': init_lfa(ks[3], d_out // 4, 'both'),
        'lfa2': init_lfa(ks[4], d_out // 2, 'single'),
        'd_out': d_out,
    }


def points_encoder_forward(params, pos, x, k):
    B, N, C = x.shape
    d_out = params['d_out']
    xf = x.reshape(B * N, C)

    # knn_graph(loop=True): k nearest neighbors (self included) per point, per batch
    sqd = pairwise_sqdist(pos)                    # Pallas
    _, idx = jax.lax.top_k(-sqd, k)               # (B, N, k)

    short = shared_mlp(xf, params['shortcut'], None)            # Linear + BN, no act
    h = shared_mlp(xf, params['mlp1'], 0.2)                     # (BN, d_out//8)
    h3 = h.reshape(B, N, -1)

    att1, rec = lfa_forward(params['lfa1'], idx, h3, pos, d_out // 4, 'both')
    att2 = lfa_forward(params['lfa2'], idx, att1.reshape(B, N, -1), pos,
                       d_out // 2, 'single')
    h = shared_mlp(att2, params['mlp2'], None)                  # (BN, d_out)
    h = h + short
    h = jnp.where(h >= 0, h, 0.2 * h)                           # LeakyReLU(0.2)
    return h.reshape(B, N, d_out), pos, rec.reshape(B, N, d_out)


# ----------------------------------------------------------------------------
# MultiScaleVoxelGatingFusion  (voxel branch)
# ----------------------------------------------------------------------------
def voxelize(features_bnc, coords_bn3, r):
    """Normalize coords, scatter-mean features into an r^3 grid (channels-last)."""
    B, N, C = features_bnc.shape
    mean = jnp.mean(coords_bn3, axis=1, keepdims=True)
    nc = coords_bn3 - mean
    norm = jnp.sqrt(jnp.sum(nc * nc, axis=2, keepdims=True))
    maxnorm = jnp.max(norm, axis=1, keepdims=True)
    nc = nc / (maxnorm * 2.0 + 1e-8) + 0.5
    nc = jnp.clip(nc * r, 0.0, r - 1.0)                        # (B, N, 3)
    vox = jnp.round(nc).astype(jnp.int32)                      # PVCNN-style round
    flat = vox[..., 0] * r * r + vox[..., 1] * r + vox[..., 2]  # (B, N)
    bidx = jnp.broadcast_to(jnp.arange(B)[:, None], (B, N))
    # TODO(synk): data-dependent scatter-mean kept in plain JAX (no rectangular tiling)
    grid_sum = jnp.zeros((B, r * r * r, C), jnp.float32).at[bidx, flat].add(features_bnc)
    cnt = jnp.zeros((B, r * r * r, 1), jnp.float32).at[bidx, flat].add(1.0)
    grid = grid_sum / jnp.maximum(cnt, 1.0)
    return grid.reshape(B, r, r, r, C), nc


def trilinear_upsample(x, F):
    """(B, s, s, s, C) -> (B, F, F, F, C), trilinear, align_corners=True."""
    s = x.shape[1]
    if s == F:
        return x
    pos = jnp.arange(F, dtype=jnp.float32) * (s - 1) / (F - 1)
    lo = jnp.floor(pos).astype(jnp.int32)
    hi = jnp.minimum(lo + 1, s - 1)
    w = pos - lo.astype(jnp.float32)

    def interp(a, axis):
        a_lo = jnp.take(a, lo, axis=axis)
        a_hi = jnp.take(a, hi, axis=axis)
        shape = [1] * a.ndim
        shape[axis] = F
        ww = w.reshape(shape)
        return a_lo * (1.0 - ww) + a_hi * ww

    y = interp(x, 1)
    y = interp(y, 2)
    y = interp(y, 3)
    return y


def trilinear_devoxelize(grid, coords_bn3, r):
    """grid: (B, r, r, r, C); coords in [0, r-1] -> (B, N, C)."""
    B = grid.shape[0]
    C = grid.shape[-1]
    N = coords_bn3.shape[1]
    gflat = grid.reshape(B, r * r * r, C)
    lo = jnp.clip(jnp.floor(coords_bn3).astype(jnp.int32), 0, r - 1)
    hi = jnp.clip(lo + 1, 0, r - 1)
    frac = jnp.clip(coords_bn3 - lo.astype(jnp.float32), 0.0, 1.0)
    bidx = jnp.broadcast_to(jnp.arange(B)[:, None], (B, N))
    out = jnp.zeros((B, N, C), jnp.float32)
    for cx, wx in ((lo[..., 0], 1 - frac[..., 0]), (hi[..., 0], frac[..., 0])):
        for cy, wy in ((lo[..., 1], 1 - frac[..., 1]), (hi[..., 1], frac[..., 1])):
            for cz, wz in ((lo[..., 2], 1 - frac[..., 2]), (hi[..., 2], frac[..., 2])):
                idx = cx * r * r + cy * r + cz
                val = gflat[bidx, idx]
                out = out + (wx * wy * wz)[..., None] * val
    return out


def init_voxel_encoder(key, in_ch, out_ch, patch_res, scale_factor):
    voxel_scale = [patch_res // f for f in scale_factor]
    n_keys = 2 * len(voxel_scale) + len(scale_factor) + 1
    ks = jax.random.split(key, n_keys)
    i = 0
    convs = []
    for _ in voxel_scale:
        c1 = init_conv3d(ks[i], in_ch, out_ch, 1e-4); i += 1
        c2 = init_conv3d(ks[i], out_ch, out_ch, 1e-4); i += 1
        convs.append((c1, c2))
    gates = []
    for _ in scale_factor:
        # TODO(synk): SharedMLP_Voxel source unavailable; modeled as pointwise
        #             Conv1d + BN(folded) + LeakyReLU(0.2).
        gates.append(fold_bn(init_linear(ks[i], out_ch, 3), 1e-6)); i += 1
    fuse = fold_bn(init_linear(ks[i], out_ch, out_ch), 1e-6)
    return {'voxel_scale': voxel_scale, 'finest': voxel_scale[0],
            'convs': convs, 'gates': gates, 'fuse': fuse}


def voxel_encoder_forward(params, local_coord, p_features_bnc):
    multi = []
    local_norm = None
    for i, r in enumerate(params['voxel_scale']):
        grid, ncoords = voxelize(p_features_bnc, local_coord, r)
        if i == 0:
            local_norm = ncoords
        c1, c2 = params['convs'][i]
        g = conv3d_bn_lrelu(grid, c1, 0.1)
        g = conv3d_bn_lrelu(g, c2, 0.1)
        multi.append(g)

    F = params['finest']
    ups = [multi[0]] + [trilinear_upsample(m, F) for m in multi[1:]]

    B = ups[0].shape[0]
    C = ups[0].shape[-1]
    HWD = F ** 3
    s0, s1, s2 = [u.reshape(B * HWD, C) for u in ups]

    fuse_f = gate_fuse(s0, s1, s2, params['gates'], params['fuse'], 0.2)
    fuse_f = fuse_f.reshape(B, F, F, F, C)
    return trilinear_devoxelize(fuse_f, local_norm, F)    # (B, N, out_ch)


# ----------------------------------------------------------------------------
# GSA module (RPETransformerLayer stand-in)
# ----------------------------------------------------------------------------
def init_gsa(key, d_model, heads=4):
    ks = jax.random.split(key, 6)
    wq = init_linear(ks[1], d_model, d_model)
    wk = init_linear(ks[2], d_model, d_model)
    wv = init_linear(ks[3], d_model, d_model)
    wqkv = {'w': jnp.concatenate([wq['w'], wk['w'], wv['w']], axis=1),
            'b': jnp.concatenate([wq['b'], wk['b'], wv['b']], axis=0)}
    return {
        'in_proj': init_linear(ks[0], 2 * d_model, d_model),
        'wqkv': wqkv,
        'geo': init_linear(ks[4], d_model, d_model),
        'out': init_linear(ks[5], d_model, d_model),
        'heads': heads,
    }


def gsa_forward(params, f_p_v, geo_f):
    # TODO(synk): RPETransformerLayer source unavailable; implemented as standard
    #             4-head attention with the geometric (rec) features injected as a
    #             relative-position-style key bias.  Attention scores are not
    #             materialized (unused downstream).
    B, N, D2 = f_p_v.shape
    H = params['heads']
    d_model = params['geo']['w'].shape[0]
    dh = d_model // H
    x = fused_linear(f_p_v.reshape(B * N, D2),
                     params['in_proj']['w'], params['in_proj']['b'], None)
    gf = fused_linear(geo_f.reshape(B * N, d_model),
                      params['geo']['w'], params['geo']['b'], None)
    qkv = fused_linear(x, params['wqkv']['w'], params['wqkv']['b'], None)
    q = qkv[:, :d_model].reshape(B, N, d_model)
    kk = (qkv[:, d_model:2 * d_model] + gf).reshape(B, N, d_model)
    v = qkv[:, 2 * d_model:].reshape(B, N, d_model)

    o = mha_attention(q, kk, v, H, 1.0 / math.sqrt(dh))
    out = fused_linear(o.reshape(B * N, d_model),
                       params['out']['w'], params['out']['b'], None)
    return out.reshape(B, N, d_model)


# ----------------------------------------------------------------------------
# MultiScale_Points_Volume_Encoder
# ----------------------------------------------------------------------------
def init_encoder(key, in_channels, out_channels, patch_res, scale_factor, k):
    keys = jax.random.split(key, len(in_channels))
    stages = []
    for i, (ci, co) in enumerate(zip(in_channels, out_channels)):
        ks = jax.random.split(keys[i], 3)
        stages.append({
            'points': init_points_encoder(ks[0], ci, co),
            'voxel': init_voxel_encoder(ks[1], ci, co, patch_res, scale_factor),
            'gsa': init_gsa(ks[2], co, heads=4),
        })
    return {'stages': stages}


def encoder_forward(params, points_f, global_coord, local_coord, k, decimation, perm_key):
    b, n, c = points_f.shape
    d = decimation
    dec_ratio = 1
    pb_stack, vb_stack, geo_stack = [], [], []
    local_stack, global_stack = [], []
    cur_f, cur_local, cur_global = points_f, local_coord, global_coord
    nstages = len(params['stages'])

    for i, stage in enumerate(params['stages']):
        cur_n = n // dec_ratio
        f_p, _pos, rec = points_encoder_forward(stage['points'], cur_global, cur_f, k)
        v_f = voxel_encoder_forward(stage['voxel'], cur_local, cur_f)
        pb_stack.append(f_p)
        vb_stack.append(v_f)
        geo_stack.append(rec)
        local_stack.append(cur_local)
        global_stack.append(cur_global)
        if i < nstages - 1:
            dec_ratio *= d
            perm_key, sub = jax.random.split(perm_key)
            idx = jax.random.permutation(sub, cur_n)[: cur_n // d]
            cur_f = f_p[:, idx, :]
            cur_local = cur_local[:, idx, :]
            cur_global = cur_global[:, idx, :]

    encoder_out = []
    for geo_f, p_f, v_f, stage in zip(geo_stack, pb_stack, vb_stack, params['stages']):
        f_p_v = jnp.concatenate([v_f, p_f], axis=2)     # voxel feats already (B,N,C)
        final_f = gsa_forward(stage['gsa'], f_p_v, geo_f)
        encoder_out.append(final_f)
    return encoder_out, local_stack, global_stack


# ----------------------------------------------------------------------------
if __name__ == "__main__":
    key = jax.random.PRNGKey(0)
    B, N = 2, 64
    in_channels = [4, 16]
    out_channels = [16, 32]
    patch_res = 8
    scale_factor = [1, 2, 4]
    k = 4
    decimation = 4

    k1, k2, k3, k4, k5 = jax.random.split(key, 5)
    points_f = jax.random.normal(k1, (B, N, in_channels[0]), jnp.float32)
    global_coord = jax.random.uniform(k2, (B, N, 3), jnp.float32)
    local_coord = jax.random.uniform(k3, (B, N, 3), jnp.float32)

    params = init_encoder(k4, in_channels, out_channels, patch_res, scale_factor, k)
    out, locs, globs = encoder_forward(params, points_f, global_coord, local_coord,
                                       k, decimation, k5)
    for o in out:
        jax.block_until_ready(o)

    assert out[0].shape == (B, N, out_channels[0])
    assert out[1].shape == (B, N // decimation, out_channels[1])
    assert all(bool(jnp.all(jnp.isfinite(o))) for o in out)
    print("KERNEL_OK")
</pallas_src>

<mosaic_0001>
module attributes {stable_mosaic.version = 11 : i64} {
  func.func @_pdist_kernel(%arg0: i32, %arg1: memref<1x64x3xf32, #tpu.memory_space<vmem>>, %arg2: memref<1x64x1xf32, #tpu.memory_space<vmem>>, %arg3: memref<1x1x64xf32, #tpu.memory_space<vmem>>, %arg4: memref<1x64x64xf32, #tpu.memory_space<vmem>>) attributes {dimension_semantics = [#tpu.dimension_semantics<parallel>], iteration_bounds = array<i64: 2>, scalar_prefetch = 0 : i64, scratch_operands = 0 : i64, tpu.core_type = #tpu.core_type<tc>, window_params = [{transform_indices = @transform_0, window_bounds = array<i64: 1, 64, 3>}, {transform_indices = @transform_1, window_bounds = array<i64: 1, 64, 1>}, {transform_indices = @transform_2, window_bounds = array<i64: 1, 1, 64>}, {transform_indices = @transform_3, window_bounds = array<i64: 1, 64, 64>}]} {
    %c0 = arith.constant 0 : index
    %c0_0 = arith.constant 0 : index
    %c0_1 = arith.constant 0 : index
    %0 = vector.load %arg1[%c0, %c0_0, %c0_1] : memref<1x64x3xf32, #tpu.memory_space<vmem>>, vector<1x64x3xf32>
    %1 = vector.shape_cast %0 : vector<1x64x3xf32> to vector<64x3xf32>
    %cst = arith.constant dense<0.000000e+00> : vector<64x64xf32>
    %2 = tpu.matmul %1, %1, %cst {dimension_numbers = #tpu.dot_dimension_numbers<[1], [1], [0], [0], [0, 0, 1, 0], [], []>} : vector<64x3xf32>, vector<64x3xf32>, vector<64x64xf32> -> vector<64x64xf32>
    %c0_2 = arith.constant 0 : index
    %c0_3 = arith.constant 0 : index
    %c0_4 = arith.constant 0 : index
    %3 = vector.load %arg2[%c0_2, %c0_3, %c0_4] : memref<1x64x1xf32, #tpu.memory_space<vmem>>, vector<1x64x1xf32>
    %4 = vector.shape_cast %3 : vector<1x64x1xf32> to vector<64x1xf32>
    %c0_5 = arith.constant 0 : index
    %c0_6 = arith.constant 0 : index
    %c0_7 = arith.constant 0 : index
    %5 = vector.load %arg3[%c0_5, %c0_6, %c0_7] : memref<1x1x64xf32, #tpu.memory_space<vmem>>, vector<1x1x64xf32>
    %6 = vector.shape_cast %5 : vector<1x1x64xf32> to vector<1x64xf32>
    %7 = vector.broadcast %4 : vector<64x1xf32> to vector<64x64xf32>
    %8 = vector.broadcast %6 : vector<1x64xf32> to vector<64x64xf32>
    %9 = arith.addf %7, %8 : vector<64x64xf32>
    %cst_8 = arith.constant 2.000000e+00 : f32
    %10 = vector.broadcast %cst_8 : f32 to vector<64x64xf32>
    %11 = arith.mulf %10, %2 : vector<64x64xf32>
    %12 = arith.subf %9, %11 : vector<64x64xf32>
    %c0_9 = arith.constant 0 : index
    %c0_10 = arith.constant 0 : index
    %c0_11 = arith.constant 0 : index
    %13 = vector.load %arg4[%c0_9, %c0_10, %c0_11] : memref<1x64x64xf32, #tpu.memory_space<vmem>>, vector<1x64x64xf32>
    %14 = vector.shape_cast %13 : vector<1x64x64xf32> to vector<64x64xf32>
    %15 = vector.shape_cast %12 : vector<64x64xf32> to vector<1x64x64xf32>
    tpu.vector_store %arg4[%c0_9, %c0_10, %c0_11], %15 {strides = array<i32>} : memref<1x64x64xf32, #tpu.memory_space<vmem>>, vector<1x64x64xf32>,
    return
  }
  func.func @transform_0(%arg0: i32) -> (i32, i32, i32) {
    %c0_i32 = arith.constant 0 : i32
    %c0_i32_0 = arith.constant 0 : i32
    %c0_i32_1 = arith.constant 0 : i32
    return %arg0, %c0_i32, %c0_i32_0 : i32, i32, i32
  }
  func.func @transform_1(%arg0: i32) -> (i32, i32, i32) {
    %c0_i32 = arith.constant 0 : i32
    %c0_i32_0 = arith.constant 0 : i32
    %c0_i32_1 = arith.constant 0 : i32
    return %arg0, %c0_i32, %c0_i32_0 : i32, i32, i32
  }
  func.func @transform_2(%arg0: i32) -> (i32, i32, i32) {
    %c0_i32 = arith.constant 0 : i32
    %c0_i32_0 = arith.constant 0 : i32
    %c0_i32_1 = arith.constant 0 : i32
    return %arg0, %c0_i32, %c0_i32_0 : i32, i32, i32
  }
  func.func @transform_3(%arg0: i32) -> (i32, i32, i32) {
    %c0_i32 = arith.constant 0 : i32
    %c0_i32_0 = arith.constant 0 : i32
    %c0_i32_1 = arith.constant 0 : i32
    return %arg0, %c0_i32, %c0_i32_0 : i32, i32, i32
  }
}

</mosaic_0001>

<bundles_post_ra>
// kernel: tpu_custom_call.1
= control target key start
LH: loop header
LB: loop body
LE: loop exit
PB: predicated region body
PF: predicated region fallthrough
CT: control target
= control target key end

     0   :  { %8 = vsyncpa [#allocation3], 0  ;;  %s841_s0 = inlined_call_operand.vmem [shape: f32[2,64,3], index: 0, kind: input, shape index: {}]   ;;  %s842_s1 = inlined_call_operand.vmem [shape: f32[2,64,1], index: 1, kind: input, shape index: {}]   ;;  %s843_s2 = inlined_call_operand.vmem [shape: f32[2,1,64], index: 2, kind: input, shape index: {}]   ;;  %s844_s3 = inlined_call_operand.hbm [shape: f32[2,64,64], index: 3, kind: output, shape index: {}]  }
   0x1   :  { %10 = vsyncpa [#allocation3 + $0x1], 0  ;;  %s651_s12 = smov 0   ;;  %s653_s13 = smov 0  }
   0x2   :  { %s655_s14 = smov 0   ;;  %s657_s15 = smov 0  }
   0x3 LB: > { %s672_s16 = sadd.s32 4294967295, %s626_s15   ;;  %s461_s17 = sadd.s32 4294967294, %s626_s15   ;;  %s626_s15 = sphi %s657_s15, %s850_s15   ;;  %s622_s14 = sphi %s655_s14, %s849_s14   ;;  %s618_s13 = sphi %s653_s13, %s848_s13   ;;  %s614_s12 = sphi %s651_s12, %s847_s12  }
   0x4   : > { %s676_s18 = sadd.s32 1, %s626_s15   ;;  %s101_s19 = sadd.s32 1, %s622_s14 }
   0x5   : > { %s98_s20 = ssub.s32 %s626_s15, %s676_s18  ;;  %p111_p0 = scmp.ne.s32.totalorder %s622_s14, %s618_s13 }
   0x6   : > { %p99_p1 = scmp.eq.s32.totalorder %s98_s20, 0  ;;  %p112_p2 = scmp.eq.s32.totalorder %s672_s16, 1 }
   0x7   : > { %p117_p3 = scmp.ne.s32.totalorder %s618_s13, %s614_s12  ;;  %p118_p4 = scmp.eq.s32.totalorder %s461_s17, 1 }
   0x8   : > { %s687_s21 = scalar_select %p99_p1, %s622_s14, %s101_s19  }
   0x9   : > { %p689_p5 = por %p112_p2, %p111_p0  ;;  %p693_p6 = por %p118_p4, %p117_p3 }
   0xa   : > { %p464_p7 = scmp.ge.s32.totalorder %s626_s15, 1  ;;  %p158_p8 = scmp.lt.s32.totalorder %s626_s15, 3 }
   0xc   : > { %p159_p9 = pnand %p464_p7, %p158_p8 }
   0xd   : > { %p190_p10 = scmp.lt.s32.totalorder (!%p159_p9), %s672_s16, 1  ;;  %s187_s8 = sand.u32 (!%p159_p9), 1, %s618_s13  }
   0xe   : > { %162 = sbr.rel (%p159_p9) target bundleno = 205 (0xcd), region = 32  ;;  %s465_s11 = sshll.u32 (!%p159_p9), %s187_s8, 6 }
   0xf   : > { %s789_s17 = scalar_lea.vmem (!%p159_p9), [#allocation2], %s465_s11  ;;  %s493_s19 = sshll.u32 (!%p159_p9), %s672_s16, 6 }
  0x10   : > { %s363_s27 = scalar_lea.sflag (!%p159_p9), [#allocation3], %s187_s8  ;;  %s584_s5 = scalar_lea.hbm (!%p159_p9), %s844_s3, 128 }
  0x13   : > { %v628_v0 = vmov 0   ;;  %s701_s24 = scalar_select %p190_p10, %s672_s16, 1  ;;  %vm211_vm0 = vcmask 23552   ;;  %vm353_vm1 = vcmask 523264  }
  0x14   : > { %561 = vset.pattern.permute.xlu1 %v628_v0  ;;  %560 = vset.pattern.permute.xlu0 %v628_v0  ;;  %s375_s16 = sshll.u32 %s789_s17, 4  ;;  %s376_s16 = int_to_ptr.vmem [resolvable:$true] %s375_s16 }
  0x15   : > { %562 = vset.pattern.permute.xlu2 %v628_v0  ;;  %s491_s25 = sshll.u32 %s701_s24, 6  ;;  %s202_s28 = scalar_lea.vmem %s843_s2, %s701_s24 }
  0x16   : > { %s711_s4 = scalar_lea.vmem %s841_s0, %s491_s25  ;;  %s716_s7 = scalar_lea.vmem %s842_s1, %s491_s25  ;;  %v563_v20 = vld [vmem:[%s202_s28] ss:$0 sm:$0xff] }
  0x17   : > { %v719_v1 = vld [vmem:[%s711_s4 + $0x38] sm:$0xff]  ;;  %v209_v2 = vld [vmem:[%s711_s4 + $0x30] sm:$0xff]  ;;  %v277_v4 = vld [vmem:[%s716_s7] sm:$0xff]  ;;  %s374_s25 = scalar_lea.hbm %s844_s3, %s493_s19 }
  0x18   : > { %470 = vmatpush.xpose.msk.msra.mxu0 %vm211_vm0, %v719_v1  ;;  %494 = vmatpush.xpose.msk.msra.mxu1 %vm211_vm0, %v719_v1  ;;  %v279_v3 = vld [vmem:[%s716_s7 + $0x10] sm:$0xff]  ;;  %v208_v5 = vld [vmem:[%s711_s4 + $0x28] sm:$0xff]  ;;  %v280_v6 = vld [vmem:[%s716_s7 + $0x18] sm:$0xff]  ;;  %s377_s26 = sshll.u32 %s374_s25, 4  ;;  %s378_s26 = int_to_ptr.hbm [resolvable:$true] %s377_s26 }
  0x19   : > { %495 = vmatpush.xpose.msk.msra.mxu2 %vm211_vm0, %v719_v1  ;;  %496 = vmatpush.xpose.msk.msra.mxu3 %vm211_vm0, %v719_v1  ;;  %v278_v7 = vld [vmem:[%s716_s7 + $0x8] sm:$0xff]  ;;  %v281_v8 = vld [vmem:[%s716_s7 + $0x20] sm:$0xff]  ;;  %v206_v10 = vld [vmem:[%s711_s4 + $0x18] sm:$0xff]  ;;  %s578_s28 = sshra.s32 %s378_s26, 4  ;;  %s579_s28 = int_to_ptr.hbm [resolvable:$true] %s578_s28 }
  0x1a   : > { %298 = vperm.xlu1 %561, %v279_v3   ;;  %288 = vperm.xlu0 %560, %v277_v4   ;;  %v207_v9 = vld [vmem:[%s711_s4 + $0x20] sm:$0xff]  ;;  %v284_v11 = vld [vmem:[%s716_s7 + $0x38] sm:$0xff]  ;;  %v283_v12 = vld [vmem:[%s716_s7 + $0x30] sm:$0xff]  ;;  %s580_s29 = scalar_lea.hbm %s579_s28, 64  ;;  %p585_p0 = scmp.lt.s32.totalorder %s579_s28, %s844_s3 }
  0x1b   : > { %308 = vperm.xlu2 %562, %v281_v8   ;;  %v282_v13 = vld [vmem:[%s716_s7 + $0x28] sm:$0xff]  ;;  %v205_v14 = vld [vmem:[%s711_s4 + $0x10] sm:$0xff]  ;;  %v203_v16 = vld [vmem:[%s711_s4] sm:$0xff]  ;;  %p581_p11 = scmp.ne.s32.totalorder %s579_s28, %s580_s29  ;;  %p586_p1 = scmp.lt.s32.totalorder %s584_s5, %s580_s29 }
  0x1c   : > { %471 = vmatpush.xpose.msk.msra.mxu0 %vm211_vm0, %v209_v2  ;;  %497 = vmatpush.xpose.msk.msra.mxu1 %vm211_vm0, %v209_v2  ;;  %v204_v15 = vld [vmem:[%s711_s4 + $0x8] sm:$0xff] }
  0x1d   : > { %498 = vmatpush.xpose.msk.msra.mxu2 %vm211_vm0, %v209_v2  ;;  %499 = vmatpush.xpose.msk.msra.mxu3 %vm211_vm0, %v209_v2  ;;  %p582_p12 = pnand %p581_p11, %p689_p5  ;;  %p587_p2 = por %p586_p1, %p585_p0 }
  0x1f   : > { %p583_p13 = pneg %p582_p12 }
  0x20   : > { %472 = vmatpush.xpose.msk.msra.mxu0 %vm211_vm0, %v208_v5  ;;  %500 = vmatpush.xpose.msk.msra.mxu1 %vm211_vm0, %v208_v5 }
  0x21   : > { %501 = vmatpush.xpose.msk.msra.mxu2 %vm211_vm0, %v208_v5  ;;  %502 = vmatpush.xpose.msk.msra.mxu3 %vm211_vm0, %v208_v5  ;;  %p588_p3 = pnand %p587_p2, %p583_p13 }
  0x22   : > { %303 = vperm.xlu1 %561, %v280_v6   ;;  %293 = vperm.xlu0 %560, %v278_v7  }
  0x23   : > { %313 = vperm.xlu2 %562, %v282_v13  }
  0x24   : > { %473 = vmatpush.xpose.msk.msra.mxu0 %vm211_vm0, %v207_v9  ;;  %503 = vmatpush.xpose.msk.msra.mxu1 %vm211_vm0, %v207_v9 }
  0x25   : > { %504 = vmatpush.xpose.msk.msra.mxu2 %vm211_vm0, %v207_v9  ;;  %505 = vmatpush.xpose.msk.msra.mxu3 %vm211_vm0, %v207_v9 }
  0x28   : > { %474 = vmatpush.xpose.msk.msra.mxu0 %vm211_vm0, %v206_v10  ;;  %506 = vmatpush.xpose.msk.msra.mxu1 %vm211_vm0, %v206_v10 }
  0x29   : > { %507 = vmatpush.xpose.msk.msra.mxu2 %vm211_vm0, %v206_v10  ;;  %508 = vmatpush.xpose.msk.msra.mxu3 %vm211_vm0, %v206_v10 }
  0x2a   : > { %323 = vperm.xlu1 %561, %v284_v11   ;;  %318 = vperm.xlu0 %560, %v283_v12  }
  0x2c   : > { %475 = vmatpush.xpose.msk.msra.mxu0 %vm211_vm0, %v205_v14  ;;  %509 = vmatpush.xpose.msk.msra.mxu1 %vm211_vm0, %v205_v14 }
  0x2d   : > { %510 = vmatpush.xpose.msk.msra.mxu2 %vm211_vm0, %v205_v14  ;;  %511 = vmatpush.xpose.msk.msra.mxu3 %vm211_vm0, %v205_v14 }
  0x30   : > { %476 = vmatpush.xpose.msk.msra.mxu0 %vm211_vm0, %v204_v15  ;;  %512 = vmatpush.xpose.msk.msra.mxu1 %vm211_vm0, %v204_v15 }
  0x31   : > { %513 = vmatpush.xpose.msk.msra.mxu2 %vm211_vm0, %v204_v15  ;;  %514 = vmatpush.xpose.msk.msra.mxu3 %vm211_vm0, %v204_v15 }
  0x34   : > { %477 = vmatpush.xpose.msk.msra.mxu0 %vm211_vm0, %v203_v16  ;;  %515 = vmatpush.xpose.msk.msra.mxu1 %vm211_vm0, %v203_v16 }
  0x35   : > { %516 = vmatpush.xpose.msk.msra.mxu2 %vm211_vm0, %v203_v16  ;;  %517 = vmatpush.xpose.msk.msra.mxu3 %vm211_vm0, %v203_v16 }
  0x37   : > { %478 = vmatmul.msk.f32.vlgmr.msra.gmra.mxu0 %vm211_vm0, %v203_v16  ;;  %480 = vmatmul.msk.f32.vlgmr.msra.gmra.mxu1 %vm211_vm0, %v205_v14 }
  0x38   : > { %482 = vmatmul.msk.f32.vlgmr.msra.gmra.mxu2 %vm211_vm0, %v207_v9  ;;  %484 = vmatmul.msk.f32.vlgmr.msra.gmra.mxu3 %vm211_vm0, %v209_v2 }
  0x3f   : > { %479 = vmatmul.msk.f32.gmra.mxu0 %vm211_vm0, %v204_v15  ;;  %481 = vmatmul.msk.f32.gmra.mxu1 %vm211_vm0, %v206_v10 }
  0x40   : > { %483 = vmatmul.msk.f32.gmra.mxu2 %vm211_vm0, %v208_v5  ;;  %485 = vmatmul.msk.f32.gmra.mxu3 %vm211_vm0, %v719_v1 }
  0x75   : > { %v309_v28 = vpop.permute.xlu2 %308 }
  0x76   : > { %v333_v32 = vadd.f32 %v563_v20, %v309_v28 }
  0x7d   : > { %v314_v49 = vpop.permute.xlu2 %313 }
  0x7e   : > { %v334_v53 = vadd.f32 %v563_v20, %v314_v49 }
  0x8c   : > { %v289_v17 = vpop.permute.xlu0 %288  ;;  %v299_v18 = vpop.permute.xlu1 %298 }
  0x8d   : > { %v331_v23 = vadd.f32 %v563_v20, %v299_v18  ;;  %v329_v24 = vadd.f32 %v563_v20, %v289_v17 }
  0x94   : > { %v294_v19 = vpop.permute.xlu0 %293  ;;  %v304_v27 = vpop.permute.xlu1 %303 }
  0x95   : > { %v332_v40 = vadd.f32 %v563_v20, %v304_v27  ;;  %v330_v41 = vadd.f32 %v563_v20, %v294_v19 }
  0x9c   : > { %v319_v31 = vpop.permute.xlu0 %318  ;;  %v324_v48 = vpop.permute.xlu1 %323 }
  0x9d   : > { %v335_v35 = vadd.f32 %v563_v20, %v319_v31  ;;  %v336_v52 = vadd.f32 %v563_v20, %v324_v48 }
  0xb4   : > { %v253_v21 = vpop.f32.mrf.mxu0  ;;  %v259_v22 = vpop.f32.mrf.mxu1 }
  0xb5   : > { %v337_v25 = vmul.f32 2.0, %v253_v21  ;;  %v339_v26 = vmul.f32 2.0, %v259_v22 }
  0xb7   : > { %v345_v29 = vsub.f32 %v329_v24, %v337_v25  ;;  %v347_v30 = vsub.f32 %v331_v23, %v339_v26 }
  0xb9   : > { %354 = vst.msk [vmem:[%s789_s17] sm:$0xff] %vm353_vm1, %v345_v29 }
  0xba   : > { %356 = vst.msk [vmem:[%s789_s17 + $0x10] sm:$0xff] %vm353_vm1, %v347_v30 }
  0xbb   : > { %v265_v33 = vpop.f32.mrf.mxu2  ;;  %v271_v34 = vpop.f32.mrf.mxu3 }
  0xbc   : > { %v341_v36 = vmul.f32 2.0, %v265_v33  ;;  %v343_v37 = vmul.f32 2.0, %v271_v34  ;;  %v256_v38 = vpop.f32.mrf.mxu0  ;;  %v262_v39 = vpop.f32.mrf.mxu1 }
  0xbd   : > { %v338_v42 = vmul.f32 2.0, %v256_v38  ;;  %v340_v43 = vmul.f32 2.0, %v262_v39 }
  0xbe   : > { %v349_v44 = vsub.f32 %v333_v32, %v341_v36  ;;  %v351_v45 = vsub.f32 %v335_v35, %v343_v37 }
  0xbf   : > { %v346_v46 = vsub.f32 %v330_v41, %v338_v42  ;;  %v348_v47 = vsub.f32 %v332_v40, %v340_v43 }
  0xc0   : > { %358 = vst.msk [vmem:[%s789_s17 + $0x20] sm:$0xff] %vm353_vm1, %v349_v44 }
  0xc1   : > { %360 = vst.msk [vmem:[%s789_s17 + $0x30] sm:$0xff] %vm353_vm1, %v351_v45 }
  0xc2   : > { %355 = vst.msk [vmem:[%s789_s17 + $0x8] sm:$0xff] %vm353_vm1, %v346_v46 }
  0xc3   : > { %357 = vst.msk [vmem:[%s789_s17 + $0x18] sm:$0xff] %vm353_vm1, %v348_v47  ;;  %v268_v50 = vpop.f32.mrf.mxu2  ;;  %v274_v51 = vpop.f32.mrf.mxu3 }
  0xc4   : > { %v342_v54 = vmul.f32 2.0, %v268_v50  ;;  %v344_v55 = vmul.f32 2.0, %v274_v51 }
  0xc6   : > { %v350_v56 = vsub.f32 %v334_v53, %v342_v54  ;;  %v352_v57 = vsub.f32 %v336_v52, %v344_v55 }
  0xc8   : > { %359 = vst.msk [vmem:[%s789_s17 + $0x28] sm:$0xff] %vm353_vm1, %v350_v56 }
  0xc9   : > { %361 = vst.msk [vmem:[%s789_s17 + $0x38] sm:$0xff] %vm353_vm1, %v352_v57 }
  0xca   : > { %591 = shalt.err (!%p588_p3)
}
  0xcb   : > { %s629_s8 = smov 128   ;;  %s630_s9 = smov 8  }
  0xcc   : > { %518 = dma.vmem_to_hbm [thread:$0]  (%p689_p5), %s376_s16, 1024, %s378_s26, %s363_s27, %s629_s8, %s629_s8, %s630_s9  }
  0xcd PF: > { %p524_p4 = scmp.ge.s32.totalorder %s626_s15, 2  ;;  %s392_s10 = sand.u32 1, %s614_s12  }
  0xce   : > { %s393_s11 = scalar_lea.sflag [#allocation3], %s392_s10 }
  0xcf   : > { %p521_p7 = pnand %p524_p4, %p693_p6 }
  0xd1   : > { %p522_p8 = pneg %p521_p7 }
  0xd3   : > { %609 = dma.done.wait (%p522_p8), %s393_s11, 1024  }
  0xd4   : > { %611 = vsyncadd (%p522_p8), %s393_s11, 4294966272  ;;  %p13_p9 = scmp.ge.s32.totalorder %s676_s18, 4   ;;  %s847_s12 = smov %s618_s13 }
  0xd5   : > { %s848_s13 = smov %s622_s14  ;;  %s849_s14 = smov %s687_s21 }
  0xd6   : > { %s850_s15 = smov %s676_s18  ;;  %15 = sbr.rel (!%p13_p9) target bundleno = 3 (0x3), region = 73 }
  0xdb   :  { %399 = vsyncpa [#allocation3], 1 }
  0xdc   :  { %401 = vsyncpa [#allocation3 + $0x1], 1 }

</bundles_post_ra>
